<compile_context>
chip_gen: v7x
topology: tpu7x:2x2x1
jax: 0.10.0
libtpu: 0.0.40
codegen_flags: <defaults>
</compile_context>

<pallas_src>
import functools

import jax
import jax.numpy as jnp
from jax.experimental import pallas as pl
from jax.experimental.pallas import tpu as pltpu


LANE = 128            # last-dim lane width (f32)
SUBLANE = 8           # second-to-last-dim alignment (f32)
MAX_TILE_B = 1024     # ~85%+ of HBM roofline; fits v5e's 16 MiB scoped-VMEM default
SINGLE_TILE_MAX = 512 # above this, force >= 2 grid steps so v7x uses both TCs


def _round_up(n: int, m: int) -> int:
    return ((n + m - 1) // m) * m


def autoencoder_kernel(x_ref, w1_ref, b1_ref, w2_ref, b2_ref, enc_ref, dec_ref):
    # fc1 + ReLU: (tile_b, D) @ (D, Hp) -> (tile_b, Hp); Hp is lane-aligned (128).
    x = x_ref[...]
    h = jnp.dot(x, w1_ref[...], preferred_element_type=jnp.float32)
    enc = jnp.maximum(h + b1_ref[...], 0.0)           # (1, Hp) bias broadcasts over rows
    # Store only the real H columns (padded bias cols are 0 -> relu(0) = 0, never stored).
    enc_ref[...] = enc[:, : enc_ref.shape[1]].astype(enc_ref.dtype)

    # fc2 + ReLU: rows H..Hp-1 of W2 are zero, so using the full-width enc is exact.
    d = jnp.dot(enc, w2_ref[...], preferred_element_type=jnp.float32)
    dec_ref[...] = jnp.maximum(d + b2_ref[...], 0.0).astype(dec_ref.dtype)


def prepare_params(w1, b1, w2, b2):
    """One-time parameter prep (call at model load, NOT per forward pass).

    torch.nn.Linear layout in:  w1 (H, D), b1 (H,), w2 (D, H), b2 (D,)
    Returns pre-transposed, hidden-dim lane-padded params:
      w1_t (D, Hp), b1 (1, Hp), w2_t (Hp, D), b2 (1, D)
    Zero padding keeps both contractions exact.
    """
    H, D = w1.shape
    Hp = _round_up(H, LANE)
    w1_t = jnp.zeros((D, Hp), w1.dtype).at[:, :H].set(w1.T)
    w2_t = jnp.zeros((Hp, D), w2.dtype).at[:H, :].set(w2.T)
    b1_p = jnp.zeros((1, Hp), b1.dtype).at[0, :H].set(b1)
    b2_p = b2.reshape(1, D)
    return (w1_t, b1_p, w2_t, b2_p), (D, H, Hp)


@functools.partial(jax.jit, static_argnames=("dims",))
def autoencoder_forward(x, params, dims):
    """x: (B, D) f32. params/dims: output of prepare_params. Returns (encode, decode)."""
    w1_t, b1_p, w2_t, b2_p = params
    D, H, Hp = dims
    B = x.shape[0]

    # Batch tiling: single tile for small batches; for B > SINGLE_TILE_MAX force at
    # least two tiles (v7x megacore), capped at MAX_TILE_B rows per tile.
    Bm = _round_up(B, SUBLANE)
    if Bm <= SINGLE_TILE_MAX:
        tile_b = Bm
    else:
        tile_b = min(MAX_TILE_B, _round_up(pl.cdiv(Bm, 2), SUBLANE))
    Bp = _round_up(B, tile_b)

    # Pad ONLY the batch dim, and only when it doesn't divide the tile.
    x_p = x if Bp == B else jnp.pad(x, ((0, Bp - B), (0, 0)))

    grid = (Bp // tile_b,)

    cost = pl.CostEstimate(
        flops=4 * Bp * D * Hp,  # two (Bp,D/Hp) x (D/Hp,Hp/D) matmuls
        transcendentals=0,
        bytes_accessed=4 * (Bp * D + D * Hp + Hp + Hp * D + D + Bp * H + Bp * D),
    )

    enc, dec = pl.pallas_call(
        autoencoder_kernel,
        out_shape=(
            jax.ShapeDtypeStruct((Bp, H), x.dtype),   # encode, exact width H
            jax.ShapeDtypeStruct((Bp, D), x.dtype),   # decode, exact width D
        ),
        grid_spec=pltpu.PrefetchScalarGridSpec(
            num_scalar_prefetch=0,
            grid=grid,
            in_specs=[
                pl.BlockSpec((tile_b, D), lambda i: (i, 0)),    # x tile (unpadded feature dim)
                pl.BlockSpec((D, Hp), lambda i: (0, 0)),        # W1 (resident)
                pl.BlockSpec((1, Hp), lambda i: (0, 0)),        # b1 (resident)
                pl.BlockSpec((Hp, D), lambda i: (0, 0)),        # W2 (resident)
                pl.BlockSpec((1, D), lambda i: (0, 0)),         # b2 (resident)
            ],
            out_specs=[
                pl.BlockSpec((tile_b, H), lambda i: (i, 0)),    # encode tile
                pl.BlockSpec((tile_b, D), lambda i: (i, 0)),    # decode tile
            ],
        ),
        compiler_params=pltpu.CompilerParams(
            dimension_semantics=("parallel",),      # megacore sharding on v7x
            vmem_limit_bytes=32 * 1024 * 1024,      # headroom on v5e's 16 MiB default
        ),
        cost_estimate=cost,
    )(x_p, w1_t, b1_p, w2_t, b2_p)

    # Only the batch dim was ever padded; slice it back if needed (cheap, often a no-op).
    if Bp != B:
        enc = enc[:B]
        dec = dec[:B]
    return enc, dec


def init_params(key, input_dim, hidden=100, dtype=jnp.float32):
    """Deterministic init mimicking nn.Linear's uniform(-1/sqrt(fan_in), 1/sqrt(fan_in))."""
    k1, k2, k3, k4 = jax.random.split(key, 4)
    bound1 = 1.0 / jnp.sqrt(input_dim)
    bound2 = 1.0 / jnp.sqrt(hidden)
    w1 = jax.random.uniform(k1, (hidden, input_dim), dtype, -bound1, bound1)
    b1 = jax.random.uniform(k2, (hidden,), dtype, -bound1, bound1)
    w2 = jax.random.uniform(k3, (input_dim, hidden), dtype, -bound2, bound2)
    b2 = jax.random.uniform(k4, (input_dim,), dtype, -bound2, bound2)
    return w1, b1, w2, b2


if __name__ == "__main__":
    key = jax.random.PRNGKey(0)
    k_x, k_p = jax.random.split(key)

    batch = 8
    input_dim = 64
    hidden = 100

    x = jax.random.normal(k_x, (batch, input_dim), jnp.float32)
    w1, b1, w2, b2 = init_params(k_p, input_dim, hidden)

    # One-time parameter prep (transpose + pad hidden dim to 128 lanes).
    params, dims = prepare_params(w1, b1, w2, b2)

    encode, decode = autoencoder_forward(x, params, dims)
    jax.block_until_ready((encode, decode))

    # Reference check in plain JAX (matches torch semantics).
    enc_ref = jnp.maximum(x @ w1.T + b1, 0.0)
    dec_ref = jnp.maximum(enc_ref @ w2.T + b2, 0.0)
    assert encode.shape == (batch, hidden)
    assert decode.shape == (batch, input_dim)
    assert jnp.allclose(encode, enc_ref, atol=1e-5, rtol=1e-5)
    assert jnp.allclose(decode, dec_ref, atol=1e-5, rtol=1e-5)

    print("KERNEL_OK")
</pallas_src>

<mosaic_0001>
module attributes {stable_mosaic.version = 11 : i64} {
  func.func @autoencoder_kernel(%arg0: i32, %arg1: memref<8x64xf32, #tpu.memory_space<vmem>>, %arg2: memref<64x128xf32, #tpu.memory_space<vmem>>, %arg3: memref<1x128xf32, #tpu.memory_space<vmem>>, %arg4: memref<128x64xf32, #tpu.memory_space<vmem>>, %arg5: memref<1x64xf32, #tpu.memory_space<vmem>>, %arg6: memref<8x100xf32, #tpu.memory_space<vmem>>, %arg7: memref<8x64xf32, #tpu.memory_space<vmem>>) attributes {dimension_semantics = [#tpu.dimension_semantics<parallel>], iteration_bounds = array<i64: 1>, scalar_prefetch = 0 : i64, scratch_operands = 0 : i64, tpu.core_type = #tpu.core_type<tc>, window_params = [{transform_indices = @transform_0, window_bounds = array<i64: 8, 64>}, {pipeline_mode = #tpu.pipeline_mode<synchronous>, transform_indices = @transform_1, window_bounds = array<i64: 64, 128>}, {pipeline_mode = #tpu.pipeline_mode<synchronous>, transform_indices = @transform_2, window_bounds = array<i64: 1, 128>}, {pipeline_mode = #tpu.pipeline_mode<synchronous>, transform_indices = @transform_3, window_bounds = array<i64: 128, 64>}, {pipeline_mode = #tpu.pipeline_mode<synchronous>, transform_indices = @transform_4, window_bounds = array<i64: 1, 64>}, {transform_indices = @transform_5, window_bounds = array<i64: 8, 100>}, {transform_indices = @transform_6, window_bounds = array<i64: 8, 64>}]} {
    %c0 = arith.constant 0 : index
    %c0_0 = arith.constant 0 : index
    %0 = vector.load %arg1[%c0, %c0_0] : memref<8x64xf32, #tpu.memory_space<vmem>>, vector<8x64xf32>
    %c0_1 = arith.constant 0 : index
    %c0_2 = arith.constant 0 : index
    %1 = vector.load %arg2[%c0_1, %c0_2] : memref<64x128xf32, #tpu.memory_space<vmem>>, vector<64x128xf32>
    %cst = arith.constant dense<0.000000e+00> : vector<8x128xf32>
    %2 = tpu.matmul %0, %1, %cst {dimension_numbers = #tpu.dot_dimension_numbers<[1], [0], [0], [1], [0, 0, 1, 1], [], []>} : vector<8x64xf32>, vector<64x128xf32>, vector<8x128xf32> -> vector<8x128xf32>
    %c0_3 = arith.constant 0 : index
    %c0_4 = arith.constant 0 : index
    %3 = vector.load %arg3[%c0_3, %c0_4] : memref<1x128xf32, #tpu.memory_space<vmem>>, vector<1x128xf32>
    %4 = vector.broadcast %3 : vector<1x128xf32> to vector<8x128xf32>
    %5 = arith.addf %2, %4 : vector<8x128xf32>
    %cst_5 = arith.constant 0.000000e+00 : f32
    %6 = vector.broadcast %cst_5 : f32 to vector<8x128xf32>
    %7 = arith.maximumf %5, %6 : vector<8x128xf32>
    %8 = vector.extract_strided_slice %7 {offsets = [0, 0], sizes = [8, 100], strides = [1, 1]} : vector<8x128xf32> to vector<8x100xf32>
    %c0_6 = arith.constant 0 : index
    %c0_7 = arith.constant 0 : index
    %9 = vector.load %arg6[%c0_6, %c0_7] : memref<8x100xf32, #tpu.memory_space<vmem>>, vector<8x100xf32>
    tpu.vector_store %arg6[%c0_6, %c0_7], %8 {strides = array<i32>} : memref<8x100xf32, #tpu.memory_space<vmem>>, vector<8x100xf32>,
    %c0_8 = arith.constant 0 : index
    %c0_9 = arith.constant 0 : index
    %10 = vector.load %arg4[%c0_8, %c0_9] : memref<128x64xf32, #tpu.memory_space<vmem>>, vector<128x64xf32>
    %cst_10 = arith.constant dense<0.000000e+00> : vector<8x64xf32>
    %11 = tpu.matmul %7, %10, %cst_10 {dimension_numbers = #tpu.dot_dimension_numbers<[1], [0], [0], [1], [0, 0, 1, 1], [], []>} : vector<8x128xf32>, vector<128x64xf32>, vector<8x64xf32> -> vector<8x64xf32>
    %c0_11 = arith.constant 0 : index
    %c0_12 = arith.constant 0 : index
    %12 = vector.load %arg5[%c0_11, %c0_12] : memref<1x64xf32, #tpu.memory_space<vmem>>, vector<1x64xf32>
    %13 = vector.broadcast %12 : vector<1x64xf32> to vector<8x64xf32>
    %14 = arith.addf %11, %13 : vector<8x64xf32>
    %cst_13 = arith.constant 0.000000e+00 : f32
    %15 = vector.broadcast %cst_13 : f32 to vector<8x64xf32>
    %16 = arith.maximumf %14, %15 : vector<8x64xf32>
    %c0_14 = arith.constant 0 : index
    %c0_15 = arith.constant 0 : index
    %17 = vector.load %arg7[%c0_14, %c0_15] : memref<8x64xf32, #tpu.memory_space<vmem>>, vector<8x64xf32>
    tpu.vector_store %arg7[%c0_14, %c0_15], %16 {strides = array<i32>} : memref<8x64xf32, #tpu.memory_space<vmem>>, vector<8x64xf32>,
    return
  }
  func.func @transform_0(%arg0: i32) -> (i32, i32) {
    %c0_i32 = arith.constant 0 : i32
    %c0_i32_0 = arith.constant 0 : i32
    return %arg0, %c0_i32 : i32, i32
  }
  func.func @transform_1(%arg0: i32) -> (i32, i32) {
    %c0_i32 = arith.constant 0 : i32
    %c0_i32_0 = arith.constant 0 : i32
    %c0_i32_1 = arith.constant 0 : i32
    return %c0_i32, %c0_i32_0 : i32, i32
  }
  func.func @transform_2(%arg0: i32) -> (i32, i32) {
    %c0_i32 = arith.constant 0 : i32
    %c0_i32_0 = arith.constant 0 : i32
    %c0_i32_1 = arith.constant 0 : i32
    return %c0_i32, %c0_i32_0 : i32, i32
  }
  func.func @transform_3(%arg0: i32) -> (i32, i32) {
    %c0_i32 = arith.constant 0 : i32
    %c0_i32_0 = arith.constant 0 : i32
    %c0_i32_1 = arith.constant 0 : i32
    return %c0_i32, %c0_i32_0 : i32, i32
  }
  func.func @transform_4(%arg0: i32) -> (i32, i32) {
    %c0_i32 = arith.constant 0 : i32
    %c0_i32_0 = arith.constant 0 : i32
    %c0_i32_1 = arith.constant 0 : i32
    return %c0_i32, %c0_i32_0 : i32, i32
  }
  func.func @transform_5(%arg0: i32) -> (i32, i32) {
    %c0_i32 = arith.constant 0 : i32
    %c0_i32_0 = arith.constant 0 : i32
    return %arg0, %c0_i32 : i32, i32
  }
  func.func @transform_6(%arg0: i32) -> (i32, i32) {
    %c0_i32 = arith.constant 0 : i32
    %c0_i32_0 = arith.constant 0 : i32
    return %arg0, %c0_i32 : i32, i32
  }
}

</mosaic_0001>

<bundles_post_ra>
// kernel: autoencoder_forward.1
= control target key start
LH: loop header
LB: loop body
LE: loop exit
PB: predicated region body
PF: predicated region fallthrough
CT: control target
= control target key end

     0   :  { %12 = vsyncpa [#allocation3], 0  ;;  %v412_v3 = vmov 0.0|0.0   ;;  %vm413_vm0 = vmmov 0   ;;  %v414_v6 = vmov 0.0   ;;  %s559_s0 = inlined_call_operand.vmem [shape: f32[8,64], index: 0, kind: input, shape index: {}]   ;;  %s560_s1 = inlined_call_operand.vmem [shape: f32[64,128], index: 1, kind: input, shape index: {}]   ;;  %s561_s2 = inlined_call_operand.vmem [shape: f32[1,128], index: 2, kind: input, shape index: {}]   ;;  %s562_s3 = inlined_call_operand.vmem [shape: f32[128,64], index: 3, kind: input, shape index: {}]   ;;  %s563_s4 = inlined_call_operand.vmem [shape: f32[1,64], index: 4, kind: input, shape index: {}]   ;;  %s564_s5 = inlined_call_operand.hbm [shape: f32[8,100], index: 5, kind: output, shape index: {0}]   ;;  %s565_s6 = inlined_call_operand.hbm [shape: f32[8,64], index: 6, kind: output, shape index: {1}]  }
   0x1   :  { %v25_v0 = vld [vmem:[%s560_s1] sm:$0xff]  ;;  %v26_v1 = vld [vmem:[%s560_s1 + $0x8] sm:$0xff]  ;;  %v27_v2 = vld [vmem:[%s560_s1 + $0x10] sm:$0xff]  ;;  %323 = vmatprep.subr.bf16.mxu0 %v412_v3  ;;  %285 = vmatprep.mubr.msk.f32.mxu0 %vm413_vm0, %v414_v6 }
   0x2   :  { %v324_v4 = vpack.c.bf16 %v26_v1, %v25_v0  ;;  %v28_v5 = vld [vmem:[%s560_s1 + $0x18] sm:$0xff]  ;;  %335 = vmatprep.subr.bf16.mxu1 %v412_v3  ;;  %320 = vmatprep.mubr.msk.f32.mxu1 %vm413_vm0, %v414_v6  ;;  %v117_v8 = vld [vmem:[%s562_s3] sm:$0xff]  ;;  %v118_v9 = vld [vmem:[%s562_s3 + $0x8] sm:$0xff] }
   0x3   :  { %v327_v7 = vpack.c.bf16 %v28_v5, %v27_v2  ;;  %v119_v10 = vld [vmem:[%s562_s3 + $0x10] sm:$0xff]  ;;  %v29_v11 = vld [vmem:[%s560_s1 + $0x20] sm:$0xff]  ;;  %v30_v12 = vld [vmem:[%s560_s1 + $0x28] sm:$0xff]  ;;  %v336_v13 = vpack.c.bf16 %v118_v9, %v117_v8 }
   0x4   :  { %325 = vmatpush3.bf16.msra.mxu0 %v324_v4  ;;  %v120_v14 = vld [vmem:[%s562_s3 + $0x18] sm:$0xff]  ;;  %v330_v16 = vpack.c.bf16 %v30_v12, %v29_v11  ;;  %v121_v17 = vld [vmem:[%s562_s3 + $0x20] sm:$0xff]  ;;  %v122_v18 = vld [vmem:[%s562_s3 + $0x28] sm:$0xff] }
   0x5   :  { %326 = vmatprep.subr.bf16.mxu0 %v412_v3  ;;  %337 = vmatpush3.bf16.msra.mxu1 %v336_v13  ;;  %v339_v15 = vpack.c.bf16 %v120_v14, %v119_v10  ;;  %v31_v19 = vld [vmem:[%s560_s1 + $0x30] sm:$0xff]  ;;  %v32_v20 = vld [vmem:[%s560_s1 + $0x38] sm:$0xff] }
   0x6   :  { %338 = vmatprep.subr.bf16.mxu1 %v412_v3 }
   0x8   :  { %328 = vmatpush3.bf16.msra.mxu0 %v327_v7 }
   0x9   :  { %329 = vmatprep.subr.bf16.mxu0 %v412_v3 }
   0xa   :  { %13 = vsyncpa [#allocation5], 0  ;;  %340 = vmatpush3.bf16.msra.mxu1 %v339_v15  ;;  %v342_v21 = vpack.c.bf16 %v122_v18, %v121_v17  ;;  %v333_v22 = vpack.c.bf16 %v32_v20, %v31_v19  ;;  %v123_v23 = vld [vmem:[%s562_s3 + $0x30] sm:$0xff]  ;;  %v124_v24 = vld [vmem:[%s562_s3 + $0x38] sm:$0xff]  ;;  %vm40_vm1 = vcmask 523264   ;;  %vm115_vm2 = vcmask 818176  }
   0xb   :  { %341 = vmatprep.subr.bf16.mxu1 %v412_v3  ;;  %v345_v25 = vpack.c.bf16 %v124_v24, %v123_v23  ;;  %v24_v26 = vld [vmem:[%s559_s0] sm:$0xff]  ;;  %v126_v28 = vld [vmem:[%s562_s3 + $0x48] sm:$0xff]  ;;  %v127_v30 = vld [vmem:[%s562_s3 + $0x50] sm:$0xff]  ;;  %s415_s23 = smov [#allocation2]  }
   0xc   :  { %331 = vmatpush3.bf16.msra.mxu0 %v330_v16  ;;  %v125_v27 = vld [vmem:[%s562_s3 + $0x40] sm:$0xff]  ;;  %v128_v31 = vld [vmem:[%s562_s3 + $0x58] sm:$0xff]  ;;  %v130_v34 = vld [vmem:[%s562_s3 + $0x68] sm:$0xff]  ;;  %s218_s24 = sshll.u32 %s415_s23, 4  ;;  %s219_s24 = int_to_ptr.vmem [resolvable:$true] %s218_s24 }
   0xd   :  { %332 = vmatprep.subr.bf16.mxu0 %v412_v3  ;;  %v348_v29 = vpack.c.bf16 %v126_v28, %v125_v27  ;;  %v351_v32 = vpack.c.bf16 %v128_v31, %v127_v30  ;;  %v129_v33 = vld [vmem:[%s562_s3 + $0x60] sm:$0xff]  ;;  %v131_v36 = vld [vmem:[%s562_s3 + $0x70] sm:$0xff]  ;;  %v132_v37 = vld [vmem:[%s562_s3 + $0x78] sm:$0xff]  ;;  %s364_s25 = scalar_lea.vmem %s219_s24, 128  ;;  %p369_p1 = scmp.lt.s32.totalorder %s219_s24, %s219_s24 }
   0xe   :  { %343 = vmatpush3.bf16.msra.mxu1 %v342_v21  ;;  %v354_v35 = vpack.c.bf16 %v130_v34, %v129_v33  ;;  %v357_v38 = vpack.c.bf16 %v132_v37, %v131_v36  ;;  %v240_v39 = vld [vmem:[%s561_s2] ss:$0 sm:$0xff]  ;;  %p365_p0 = scmp.ne.s32.totalorder %s219_s24, %s364_s25  ;;  %p370_p2 = scmp.lt.s32.totalorder %s364_s25, %s364_s25 }
   0xf   :  { %344 = vmatprep.subr.bf16.mxu1 %v412_v3 }
  0x10   :  { %334 = vmatpush3.bf16.msra.mxu0 %v333_v22  ;;  %p371_p3 = por %p370_p2, %p369_p1 }
  0x12   :  { %346 = vmatpush3.bf16.msra.mxu1 %v345_v25  ;;  %p372_p4 = pnand %p371_p3, %p365_p0 }
  0x13   :  { %286 = vmatmul.mubr.msk.f32.vlgmr.msra.gmra.mrb[0].mxu0 %vm40_vm1, %v24_v26  ;;  %347 = vmatprep.subr.bf16.mxu1 %v412_v3 }
  0x16   :  { %349 = vmatpush3.bf16.msra.mxu1 %v348_v29 }
  0x17   :  { %350 = vmatprep.subr.bf16.mxu1 %v412_v3 }
  0x1a   :  { %352 = vmatpush3.bf16.msra.mxu1 %v351_v32 }
  0x1b   :  { %353 = vmatprep.subr.bf16.mxu1 %v412_v3 }
  0x1e   :  { %355 = vmatpush3.bf16.msra.mxu1 %v354_v35 }
  0x1f   :  { %356 = vmatprep.subr.bf16.mxu1 %v412_v3 }
  0x22   :  { %358 = vmatpush3.bf16.msra.mxu1 %v357_v38 }
  0xe6   :  { %v110_v40 = vpop.f32.mrb[0].mxu0 }
  0xe7   :  { %v111_v41 = vadd.f32 %v240_v39, %v110_v40  ;;  %v287_v42 = vpop.f32.mrb[1].mxu0 }
  0xe9   :  { %v114_v43 = vmax.f32 %v111_v41, 0.0 }
  0xeb   :  { %321 = vmatmul.mubr.f32.vlgmr.msra.gmra.mrb[0].mxu1 %v114_v43  ;;  %116 = vst.msk [vmem:[#allocation2] sm:$0xff] %vm115_vm2, %v114_v43 }
  0xec   :  { %375 = shalt.err (!%p372_p4)
}
  0xed   :  { %s376_s2 = scalar_lea.hbm %s564_s5, 128 }
  0xee   :  { %p377_p5 = scmp.ne.s32.totalorder %s564_s5, %s376_s2  ;;  %p380_p6 = scmp.lt.u32.totalorder %s376_s2, %s564_s5 }
  0xf0   :  { %p382_p7 = pnand %p380_p6, %p377_p5 }
  0xf2   :  { %385 = shalt.err (!%p382_p7)
}
  0xf3   :  { %221 = dma.vmem_to_hbm [thread:$0]  %s219_s24, 128, %s564_s5, [#allocation3]   ;;  %v242_v44 = vld [vmem:[%s563_s4] ss:$0 sm:$0xff] }
  0xf4   :  { %s416_s10 = smov [#allocation4]  }
  0xf5   :  { %s228_s11 = sshll.u32 %s416_s10, 4  ;;  %s229_s11 = int_to_ptr.vmem [resolvable:$true] %s228_s11 }
  0xf6   :  { %s386_s0 = scalar_lea.vmem %s229_s11, 128  ;;  %p391_p9 = scmp.lt.s32.totalorder %s229_s11, %s229_s11 }
  0xf7   :  { %p387_p8 = scmp.ne.s32.totalorder %s229_s11, %s386_s0  ;;  %p392_p10 = scmp.lt.s32.totalorder %s386_s0, %s386_s0 }
  0xf9   :  { %p393_p11 = por %p392_p10, %p391_p9 }
  0xfb   :  { %p394_p12 = pnand %p393_p11, %p387_p8 }
 0x1be   :  { %v206_v45 = vpop.f32.mrb[0].mxu1 }
 0x1bf   :  { %v207_v46 = vadd.f32 %v242_v44, %v206_v45  ;;  %v322_v47 = vpop.f32.mrb[1].mxu1 }
 0x1c1   :  { %v210_v48 = vmax.f32 %v207_v46, 0.0 }
 0x1c3   :  { %211 = vst.msk [vmem:[#allocation4] sm:$0xff] %vm40_vm1, %v210_v48 }
 0x1c4   :  { %397 = shalt.err (!%p394_p12)
}
 0x1c5   :  { %s398_s4 = scalar_lea.hbm %s565_s6, 128 }
 0x1c6   :  { %p399_p13 = scmp.ne.s32.totalorder %s565_s6, %s398_s4  ;;  %p402_p0 = scmp.lt.u32.totalorder %s398_s4, %s565_s6 }
 0x1c8   :  { %p404_p1 = pnand %p402_p0, %p399_p13 }
 0x1ca   :  { %407 = shalt.err (!%p404_p1)
}
 0x1cb   :  { %231 = dma.vmem_to_hbm [thread:$0]  %s229_s11, 128, %s565_s6, [#allocation5]  }
 0x1cc   :  { %408 = dma.done.wait [#allocation3], 128  }
 0x1cd   :  { %409 = vsyncadd [#allocation3], 4294967168 }
 0x1ce   :  { %410 = dma.done.wait [#allocation5], 128  }
 0x1cf   :  { %411 = vsyncadd [#allocation5], 4294967168 }
 0x1d0   :  { %238 = vsyncpa [#allocation3], 1 }
 0x1d1   :  { %239 = vsyncpa [#allocation5], 1 }

</bundles_post_ra>
